<compile_context>
chip_gen: v6e
topology: v6e:2x2x1
jax: 0.10.0
libtpu: 0.0.40
codegen_flags: <defaults>
</compile_context>

<pallas_src>
import jax
import jax.numpy as jnp
from jax.experimental import pallas as pl
from jax.experimental.pallas import tpu as pltpu

LANE = 128
SUB = 8            # f32 sublanes; shape of the per-core vector accumulator
ROW_ALIGN = 16     # row tiles stay multiples of 16 so bf16 sublane packing is clean
NCORES = 2         # leading 'parallel' grid axis (both TCs on v7x, serial elsewhere)
MAX_TILE_R = 1024  # 7 * 1024 * 128 * 4B ≈ 3.5 MiB per input buffer (double-buffered)


def _round_up(x, m):
    return ((x + m - 1) // m) * m


def _ce_sum_kernel(x_ref, out_ref):
    """x_ref: (7, tile_r, 128) stacked [s0, s1, e0, e1, s_lbl, e_lbl, mask].

    out_ref: (8, 128) f32 partial-sum block, resident across the reduction axis.
    """
    # Zero the vector accumulator on the first step of the reduction axis.
    @pl.when(pl.program_id(1) == 0)
    def _():
        out_ref[...] = jnp.zeros_like(out_ref)

    x = x_ref[...].astype(jnp.float32)
    s0, s1, e0, e1, sl, el, m = (x[i] for i in range(7))

    def ce2(l0, l1, tgt):
        # 2-class cross-entropy == softplus(l_other - l_target), tgt in {0., 1.}.
        d = (l1 - l0) * (1.0 - 2.0 * tgt)
        # Stable softplus: max(d,0) carries the magnitude, exp/log go to the EUP.
        return jnp.maximum(d, 0.0) + jnp.log(1.0 + jnp.exp(-jnp.abs(d)))

    loss = (ce2(s0, s1, sl) + ce2(e0, e1, el)) * m          # (tile_r, 128)
    # Pure-VPU partial reduction: (tile_r,128) -> (tile_r/8, 8, 128) vreg-wise adds.
    out_ref[...] += loss.reshape(-1, SUB, LANE).sum(axis=0)


def cross_entropy_loss(start_logits, end_logits, start_label, end_label, seq_mask):
    """Forward of the PyTorch `cross_entropy` module."""
    batch = seq_mask.shape[0]  # PyTorch divides by seq_mask.size()[0]

    # Keep the HBM slab narrow when the incoming logits are bf16 (labels/mask are
    # exactly representable 0/1); all arithmetic is f32 inside the kernel.
    io_dtype = jnp.bfloat16 if start_logits.dtype == jnp.bfloat16 else jnp.float32

    s = start_logits.reshape(-1, 2)
    e = end_logits.reshape(-1, 2)
    n = s.shape[0]

    # Single fused pad+stack producing one lane-dense (7, rows, 128) slab.
    vals = jnp.stack(
        [
            s[:, 0].astype(io_dtype),
            s[:, 1].astype(io_dtype),
            e[:, 0].astype(io_dtype),
            e[:, 1].astype(io_dtype),
            start_label.reshape(-1).astype(io_dtype),
            end_label.reshape(-1).astype(io_dtype),
            seq_mask.reshape(-1).astype(io_dtype),
        ],
        axis=0,
    )

    rows = -(-n // LANE)
    # Tiny inputs: don't burn a second core on pure padding.
    ncores = NCORES if rows >= NCORES * ROW_ALIGN else 1
    tile_r = min(MAX_TILE_R, _round_up(-(-rows // ncores), ROW_ALIGN))
    rows_pad = _round_up(rows, ncores * tile_r)
    steps = rows_pad // (ncores * tile_r)

    # Padded mask entries are 0 -> padded elements contribute nothing.
    vals = jnp.pad(vals, ((0, 0), (0, rows_pad * LANE - n)))
    vals = vals.reshape(7, rows_pad, LANE)

    in_spec = pl.BlockSpec((7, tile_r, LANE), lambda c, i: (0, c * steps + i, 0))
    out_spec = pl.BlockSpec((SUB, LANE), lambda c, i: (c, 0))

    partials = pl.pallas_call(
        _ce_sum_kernel,
        out_shape=jax.ShapeDtypeStruct((ncores * SUB, LANE), jnp.float32),
        grid_spec=pltpu.PrefetchScalarGridSpec(
            num_scalar_prefetch=0,
            grid=(ncores, steps),
            in_specs=[in_spec],
            out_specs=out_spec,
        ),
        compiler_params=pltpu.CompilerParams(
            dimension_semantics=("parallel", "arbitrary"),
            vmem_limit_bytes=32 * 1024 * 1024,
        ),
    )(vals)

    # Final tiny reduce (ncores*8*128 f32) + PyTorch-style divide stays in JAX glue.
    return jnp.sum(partials) / jnp.float32(batch)


def _reference(start_logits, end_logits, start_label, end_label, seq_mask):
    def ce(logits, labels):
        logits = logits.reshape(-1, 2).astype(jnp.float32)
        labels = labels.reshape(-1).astype(jnp.int32)
        lse = jax.nn.logsumexp(logits, axis=-1)
        l_t = jnp.take_along_axis(logits, labels[:, None], axis=-1)[:, 0]
        return lse - l_t

    sum_loss = ce(start_logits, start_label) + ce(end_logits, end_label)
    sum_loss = sum_loss * seq_mask.reshape(-1).astype(jnp.float32)
    return jnp.sum(sum_loss) / seq_mask.shape[0]


if __name__ == "__main__":
    def make_inputs(key, B, S):
        k1, k2, k3, k4, k5 = jax.random.split(key, 5)
        return (
            jax.random.normal(k1, (B, S, 2), dtype=jnp.float32),
            jax.random.normal(k2, (B, S, 2), dtype=jnp.float32),
            jax.random.randint(k3, (B, S), 0, 2, dtype=jnp.int32),
            jax.random.randint(k4, (B, S), 0, 2, dtype=jnp.int32),
            (jax.random.uniform(k5, (B, S)) > 0.25).astype(jnp.float32),
        )

    # Small shape implied by the module: batch=2, seq=8, 2 classes.
    args = make_inputs(jax.random.PRNGKey(0), 2, 8)
    out = cross_entropy_loss(*args)
    jax.block_until_ready(out)
    ref = _reference(*args)
    assert jnp.allclose(out, ref, atol=1e-5, rtol=1e-5), (out, ref)

    # Larger case exercising padding, multi-vreg tiles and both grid cores.
    args2 = make_inputs(jax.random.PRNGKey(1), 4, 1000)
    out2 = cross_entropy_loss(*args2)
    jax.block_until_ready(out2)
    ref2 = _reference(*args2)
    assert jnp.allclose(out2, ref2, atol=1e-4, rtol=1e-4), (out2, ref2)

    print("KERNEL_OK")
</pallas_src>

<mosaic_0001>
module attributes {stable_mosaic.version = 11 : i64} {
  func.func @_ce_sum_kernel(%arg0: i32, %arg1: i32, %arg2: memref<7x16x128xf32, #tpu.memory_space<vmem>>, %arg3: memref<8x128xf32, #tpu.memory_space<vmem>>) attributes {dimension_semantics = [#tpu.dimension_semantics<parallel>, #tpu.dimension_semantics<arbitrary>], iteration_bounds = array<i64: 1, 1>, scalar_prefetch = 0 : i64, scratch_operands = 0 : i64, tpu.core_type = #tpu.core_type<tc>, window_params = [{transform_indices = @transform_0, window_bounds = array<i64: 7, 16, 128>}, {transform_indices = @transform_1, window_bounds = array<i64: 8, 128>}]} {
    %c0_i32 = arith.constant 0 : i32
    %0 = arith.cmpi eq, %arg1, %c0_i32 : i32
    %1 = arith.extui %0 : i1 to i32
    %c0_i32_0 = arith.constant 0 : i32
    %2 = arith.cmpi ne, %1, %c0_i32_0 : i32
    scf.if %2 {
      %cst_17 = arith.constant 0.000000e+00 : f32
      %57 = vector.broadcast %cst_17 : f32 to vector<8x128xf32>
      %c0_18 = arith.constant 0 : index
      %c0_19 = arith.constant 0 : index
      %58 = vector.load %arg3[%c0_18, %c0_19] : memref<8x128xf32, #tpu.memory_space<vmem>>, vector<8x128xf32>
      tpu.vector_store %arg3[%c0_18, %c0_19], %57 {strides = array<i32>} : memref<8x128xf32, #tpu.memory_space<vmem>>, vector<8x128xf32>,
    } else {
    }
    %c0 = arith.constant 0 : index
    %c0_1 = arith.constant 0 : index
    %c0_2 = arith.constant 0 : index
    %3 = vector.load %arg2[%c0, %c0_1, %c0_2] : memref<7x16x128xf32, #tpu.memory_space<vmem>>, vector<7x16x128xf32>
    %4 = vector.extract_strided_slice %3 {offsets = [0, 0, 0], sizes = [1, 16, 128], strides = [1, 1, 1]} : vector<7x16x128xf32> to vector<1x16x128xf32>
    %5 = vector.shape_cast %4 : vector<1x16x128xf32> to vector<16x128xf32>
    %6 = vector.extract_strided_slice %3 {offsets = [1, 0, 0], sizes = [1, 16, 128], strides = [1, 1, 1]} : vector<7x16x128xf32> to vector<1x16x128xf32>
    %7 = vector.shape_cast %6 : vector<1x16x128xf32> to vector<16x128xf32>
    %8 = vector.extract_strided_slice %3 {offsets = [2, 0, 0], sizes = [1, 16, 128], strides = [1, 1, 1]} : vector<7x16x128xf32> to vector<1x16x128xf32>
    %9 = vector.shape_cast %8 : vector<1x16x128xf32> to vector<16x128xf32>
    %10 = vector.extract_strided_slice %3 {offsets = [3, 0, 0], sizes = [1, 16, 128], strides = [1, 1, 1]} : vector<7x16x128xf32> to vector<1x16x128xf32>
    %11 = vector.shape_cast %10 : vector<1x16x128xf32> to vector<16x128xf32>
    %12 = vector.extract_strided_slice %3 {offsets = [4, 0, 0], sizes = [1, 16, 128], strides = [1, 1, 1]} : vector<7x16x128xf32> to vector<1x16x128xf32>
    %13 = vector.shape_cast %12 : vector<1x16x128xf32> to vector<16x128xf32>
    %14 = vector.extract_strided_slice %3 {offsets = [5, 0, 0], sizes = [1, 16, 128], strides = [1, 1, 1]} : vector<7x16x128xf32> to vector<1x16x128xf32>
    %15 = vector.shape_cast %14 : vector<1x16x128xf32> to vector<16x128xf32>
    %16 = vector.extract_strided_slice %3 {offsets = [6, 0, 0], sizes = [1, 16, 128], strides = [1, 1, 1]} : vector<7x16x128xf32> to vector<1x16x128xf32>
    %17 = vector.shape_cast %16 : vector<1x16x128xf32> to vector<16x128xf32>
    %18 = arith.subf %7, %5 : vector<16x128xf32>
    %cst = arith.constant 2.000000e+00 : f32
    %19 = vector.broadcast %cst : f32 to vector<16x128xf32>
    %20 = arith.mulf %19, %13 : vector<16x128xf32>
    %cst_3 = arith.constant 1.000000e+00 : f32
    %21 = vector.broadcast %cst_3 : f32 to vector<16x128xf32>
    %22 = arith.subf %21, %20 : vector<16x128xf32>
    %23 = arith.mulf %18, %22 : vector<16x128xf32>
    %cst_4 = arith.constant 0.000000e+00 : f32
    %24 = vector.broadcast %cst_4 : f32 to vector<16x128xf32>
    %25 = arith.maximumf %23, %24 : vector<16x128xf32>
    %26 = math.absf %23 : vector<16x128xf32>
    %cst_5 = arith.constant 0.000000e+00 : f32
    %27 = vector.broadcast %cst_5 : f32 to vector<16x128xf32>
    %28 = arith.subf %27, %26 : vector<16x128xf32>
    %29 = math.exp %28 : vector<16x128xf32>
    %cst_6 = arith.constant 1.000000e+00 : f32
    %30 = vector.broadcast %cst_6 : f32 to vector<16x128xf32>
    %31 = arith.addf %30, %29 : vector<16x128xf32>
    %32 = math.log %31 : vector<16x128xf32>
    %33 = arith.addf %25, %32 : vector<16x128xf32>
    %34 = arith.subf %11, %9 : vector<16x128xf32>
    %cst_7 = arith.constant 2.000000e+00 : f32
    %35 = vector.broadcast %cst_7 : f32 to vector<16x128xf32>
    %36 = arith.mulf %35, %15 : vector<16x128xf32>
    %cst_8 = arith.constant 1.000000e+00 : f32
    %37 = vector.broadcast %cst_8 : f32 to vector<16x128xf32>
    %38 = arith.subf %37, %36 : vector<16x128xf32>
    %39 = arith.mulf %34, %38 : vector<16x128xf32>
    %cst_9 = arith.constant 0.000000e+00 : f32
    %40 = vector.broadcast %cst_9 : f32 to vector<16x128xf32>
    %41 = arith.maximumf %39, %40 : vector<16x128xf32>
    %42 = math.absf %39 : vector<16x128xf32>
    %cst_10 = arith.constant 0.000000e+00 : f32
    %43 = vector.broadcast %cst_10 : f32 to vector<16x128xf32>
    %44 = arith.subf %43, %42 : vector<16x128xf32>
    %45 = math.exp %44 : vector<16x128xf32>
    %cst_11 = arith.constant 1.000000e+00 : f32
    %46 = vector.broadcast %cst_11 : f32 to vector<16x128xf32>
    %47 = arith.addf %46, %45 : vector<16x128xf32>
    %48 = math.log %47 : vector<16x128xf32>
    %49 = arith.addf %41, %48 : vector<16x128xf32>
    %50 = arith.addf %33, %49 : vector<16x128xf32>
    %51 = arith.mulf %50, %17 : vector<16x128xf32>
    %c0_12 = arith.constant 0 : index
    %c0_13 = arith.constant 0 : index
    %52 = vector.load %arg3[%c0_12, %c0_13] : memref<8x128xf32, #tpu.memory_space<vmem>>, vector<8x128xf32>
    %53 = vector.shape_cast %51 : vector<16x128xf32> to vector<2x8x128xf32>
    %cst_14 = arith.constant dense<0.000000e+00> : vector<8x128xf32>
    %54 = vector.multi_reduction <add>, %53, %cst_14 [0] : vector<2x8x128xf32> to vector<8x128xf32>
    %55 = arith.addf %52, %54 : vector<8x128xf32>
    %c0_15 = arith.constant 0 : index
    %c0_16 = arith.constant 0 : index
    %56 = vector.load %arg3[%c0_15, %c0_16] : memref<8x128xf32, #tpu.memory_space<vmem>>, vector<8x128xf32>
    tpu.vector_store %arg3[%c0_15, %c0_16], %55 {strides = array<i32>} : memref<8x128xf32, #tpu.memory_space<vmem>>, vector<8x128xf32>,
    return
  }
  func.func @transform_0(%arg0: i32, %arg1: i32) -> (i32, i32, i32) {
    %c1_i32 = arith.constant 1 : i32
    %0 = arith.muli %arg0, %c1_i32 : i32
    %1 = arith.addi %0, %arg1 : i32
    %c0_i32 = arith.constant 0 : i32
    %c0_i32_0 = arith.constant 0 : i32
    %c0_i32_1 = arith.constant 0 : i32
    return %c0_i32, %1, %c0_i32_0 : i32, i32, i32
  }
  func.func @transform_1(%arg0: i32, %arg1: i32) -> (i32, i32) {
    %c0_i32 = arith.constant 0 : i32
    %c0_i32_0 = arith.constant 0 : i32
    return %arg0, %c0_i32 : i32, i32
  }
}

</mosaic_0001>

<bundles_post_ra>
// kernel: tpu_custom_call.1
= control target key start
LH: loop header
LB: loop body
LE: loop exit
PB: predicated region body
PF: predicated region fallthrough
CT: control target
= control target key end

     0   :  { %6 = vsyncpa [#allocation3], 0  ;;  %s208_s0 = inlined_call_operand.hbm [shape: f32[7,16,128], index: 0, kind: input, shape index: {}]   ;;  %s209_s1 = inlined_call_operand.hbm [shape: f32[8,128], index: 1, kind: output, shape index: {}]  }
   0x1   :  { %7 = vsyncpa [#allocation4], 0  ;;  %s188_s6 = smov [#allocation2]  }
   0x2   :  { %s17_s7 = sshll.u32 %s188_s6, 4  ;;  %s18_s7 = int_to_ptr.vmem [resolvable:$true] %s17_s7 }
   0x3   :  { %s152_s8 = scalar_lea.vmem %s18_s7, 1792  ;;  %p157_p1 = scmp.lt.s32.totalorder %s18_s7, %s18_s7 }
   0x4   :  { %p153_p0 = scmp.ne.s32.totalorder %s18_s7, %s152_s8  ;;  %p158_p2 = scmp.lt.s32.totalorder %s152_s8, %s152_s8 }
   0x6   :  { %p159_p3 = por %p158_p2, %p157_p1 }
   0x8   :  { %p160_p4 = pnand %p159_p3, %p153_p0 }
   0xa   :  { %163 = shalt.err (!%p160_p4)
}
   0xb   :  { %s189_s9 = smov 128   ;;  %s190_s10 = smov 8  }
   0xc   :  { %23 = dma.hbm_to_vmem [thread:$0]  %s208_s0, 1792, %s18_s7, [#allocation3], %s189_s9, %s189_s9, %s190_s10  }
   0xd   :  { %184 = dma.done.wait [#allocation3], 1792  }
   0xe   :  { %185 = vsyncadd [#allocation3], 4294965504  ;;  %v34_v0 = vld [vmem:[#allocation2] sm:$0xff]  ;;  %v35_v1 = vld [vmem:[#allocation2 + $0x8] sm:$0xff]  ;;  %s191_s0 = smov [#allocation5]  }
   0xf   :  { %v36_v2 = vld [vmem:[#allocation2 + $0x10] sm:$0xff]  ;;  %v37_v3 = vld [vmem:[#allocation2 + $0x18] sm:$0xff]  ;;  %v38_v4 = vld [vmem:[#allocation2 + $0x20] sm:$0xff]  ;;  %s114_s13 = sshll.u32 %s191_s0, 4  ;;  %s115_s13 = int_to_ptr.vmem [resolvable:$true] %s114_s13 }
  0x10   :  { %v39_v5 = vld [vmem:[#allocation2 + $0x28] sm:$0xff]  ;;  %v40_v6 = vld [vmem:[#allocation2 + $0x30] sm:$0xff]  ;;  %v41_v7 = vld [vmem:[#allocation2 + $0x38] sm:$0xff]  ;;  %v48_v12 = vsub.f32 %v36_v2, %v34_v0  ;;  %v49_v13 = vsub.f32 %v37_v3, %v35_v1  ;;  %s164_s14 = scalar_lea.vmem %s115_s13, 128  ;;  %p169_p6 = scmp.lt.s32.totalorder %s115_s13, %s115_s13 }
  0x11   :  { %v42_v8 = vld [vmem:[#allocation2 + $0x40] sm:$0xff]  ;;  %v43_v9 = vld [vmem:[#allocation2 + $0x48] sm:$0xff]  ;;  %v44_v10 = vld [vmem:[#allocation2 + $0x50] sm:$0xff]  ;;  %v74_v15 = vsub.f32 %v40_v6, %v38_v4  ;;  %v75_v17 = vsub.f32 %v41_v7, %v39_v5  ;;  %p165_p5 = scmp.ne.s32.totalorder %s115_s13, %s164_s14  ;;  %p170_p7 = scmp.lt.s32.totalorder %s164_s14, %s164_s14 }
  0x12   :  { %v45_v11 = vld [vmem:[#allocation2 + $0x58] sm:$0xff]  ;;  %v50_v14 = vmul.f32 2.0, %v42_v8  ;;  %v51_v16 = vmul.f32 2.0, %v43_v9  ;;  %v76_v18 = vmul.f32 2.0, %v44_v10  ;;  %v46_v63 = vld [vmem:[#allocation2 + $0x60] sm:$0xff]  ;;  %v47_v1 = vld [vmem:[#allocation2 + $0x68] sm:$0xff] }
  0x13   :  { %v77_v19 = vmul.f32 2.0, %v45_v11  ;;  %p171_p8 = por %p170_p7, %p169_p6 }
  0x14   :  { %v52_v20 = vsub.f32 1.0, %v50_v14  ;;  %v53_v21 = vsub.f32 1.0, %v51_v16  ;;  %v78_v22 = vsub.f32 1.0, %v76_v18 }
  0x15   :  { %v79_v23 = vsub.f32 1.0, %v77_v19  ;;  %p172_p9 = pnand %p171_p8, %p165_p5 }
  0x16   :  { %v54_v24 = vmul.f32 %v52_v20, %v48_v12  ;;  %v55_v25 = vmul.f32 %v53_v21, %v49_v13  ;;  %v80_v26 = vmul.f32 %v78_v22, %v74_v15 }
  0x17   :  { %v81_v27 = vmul.f32 %v79_v23, %v75_v17 }
  0x18   :  { %v58_v28 = vand.u32 2147483647, %v54_v24  ;;  %v59_v29 = vand.u32 2147483647, %v55_v25  ;;  %v84_v31 = vand.u32 2147483647, %v80_v26 }
  0x19   :  { %v85_v32 = vand.u32 2147483647, %v81_v27  ;;  %v56_v48 = vmax.f32 %v54_v24, 0.0  ;;  %v57_v50 = vmax.f32 %v55_v25, 0.0  ;;  %v82_v53 = vmax.f32 %v80_v26, 0.0 }
  0x1a   :  { %v60_v30 = vsub.f32 0.0, %v58_v28  ;;  %v61_v33 = vsub.f32 0.0, %v59_v29  ;;  %v86_v35 = vsub.f32 0.0, %v84_v31  ;;  %v83_v56 = vmax.f32 %v81_v27, 0.0 }
  0x1b   :  { %v87_v36 = vsub.f32 0.0, %v85_v32 }
  0x1c   :  { %v62_v34 = vmul.f32 1.442695, %v60_v30  ;;  %v64_v37 = vmul.f32 1.442695, %v61_v33  ;;  %v88_v38 = vmul.f32 1.442695, %v86_v35 }
  0x1d   :  { %v90_v39 = vmul.f32 1.442695, %v87_v36 }
  0x1e   :  { %128 = vpow2.f32 %v62_v34 }
  0x1f   :  { %130 = vpow2.f32 %v64_v37 }
  0x20   :  { %132 = vpow2.f32 %v88_v38 }
  0x21   :  { %134 = vpow2.f32 %v90_v39 }
  0x2b   :  { %v129_v40 = vpop.eup %128 }
  0x2c   :  { %v131_v41 = vpop.eup %130  ;;  %v66_v42 = vadd.f32 1.0, %v129_v40 }
  0x2d   :  { %v133_v43 = vpop.eup %132  ;;  %v67_v44 = vadd.f32 1.0, %v131_v41 }
  0x2e   :  { %v135_v45 = vpop.eup %134  ;;  %136 = vlog2.f32 %v66_v42  ;;  %v92_v46 = vadd.f32 1.0, %v133_v43 }
  0x2f   :  { %138 = vlog2.f32 %v67_v44  ;;  %v93_v47 = vadd.f32 1.0, %v135_v45 }
  0x30   :  { %140 = vlog2.f32 %v92_v46 }
  0x31   :  { %142 = vlog2.f32 %v93_v47 }
  0x3b   :  { %v137_v49 = vpop.eup %136 }
  0x3c   :  { %v139_v51 = vpop.eup %138  ;;  %v69_v52 = vmul.f32 0.6931472, %v137_v49 }
  0x3d   :  { %v141_v54 = vpop.eup %140  ;;  %v71_v55 = vmul.f32 0.6931472, %v139_v51 }
  0x3e   :  { %v143_v57 = vpop.eup %142  ;;  %v72_v58 = vadd.f32 %v69_v52, %v56_v48  ;;  %v95_v59 = vmul.f32 0.6931472, %v141_v54 }
  0x3f   :  { %v73_v60 = vadd.f32 %v71_v55, %v57_v50  ;;  %v97_v61 = vmul.f32 0.6931472, %v143_v57 }
  0x40   :  { %v98_v62 = vadd.f32 %v95_v59, %v82_v53 }
  0x41   :  { %v99_v0 = vadd.f32 %v97_v61, %v83_v56 }
  0x42   :  { %v100_v2 = vadd.f32 %v98_v62, %v72_v58 }
  0x43   :  { %v101_v3 = vadd.f32 %v99_v0, %v73_v60 }
  0x44   :  { %v102_v4 = vmul.f32 %v100_v2, %v46_v63 }
  0x45   :  { %v103_v5 = vmul.f32 %v101_v3, %v47_v1 }
  0x47   :  { %v105_v6 = vadd.f32 %v103_v5, %v102_v4 }
  0x49   :  { %107 = vst [vmem:[#allocation5] sm:$0xff] %v105_v6 }
  0x4a   :  { %175 = shalt.err (!%p172_p9)
}
  0x4b   :  { %117 = dma.vmem_to_hbm [thread:$0]  %s115_s13, 128, %s209_s1, [#allocation4]  }
  0x4c   :  { %186 = dma.done.wait [#allocation4], 128  }
  0x4d   :  { %187 = vsyncadd [#allocation4], 4294967168 }
  0x4e   :  { %121 = vsyncpa [#allocation3], 1 }
  0x4f   :  { %122 = vsyncpa [#allocation4], 1 }

</bundles_post_ra>
